<compile_context>
chip_gen: v5e
topology: v5e:2x2
jax: 0.10.0
libtpu: 0.0.40
codegen_flags: <defaults>
</compile_context>

<pallas_src>
import math

import jax
import jax.numpy as jnp
from jax.experimental import pallas as pl
from jax.experimental.pallas import tpu as pltpu

LN_EPS = 1e-5  # torch.nn.LayerNorm default


def _round_up(n, m):
    return ((n + m - 1) // m) * m


def _make_mlp_kernel(d_in_true):
    """Kernel factory closing over the *true* (un-padded) feature count."""
    inv_d = 1.0 / float(d_in_true)

    def kernel(x_ref, gamma_ref, beta_ref, w_ref, b_ref, o_ref, xn_ref):
        # x_ref:      (tm, D_in_pad)   bf16 token rows
        # gamma/beta: (1, D_in_pad)    f32 LN affine (zero in padded columns)
        # w_ref:      (D_in_pad, tn)   bf16 fc weight N-slab
        # b_ref:      (1, tn)          f32 fc bias N-slab
        # o_ref:      (tm, tn)         output tile
        # xn_ref:     (tm, D_in_pad)   bf16 scratch: normalized rows, computed
        #                              once per row tile (j == 0), reused j > 0
        j = pl.program_id(1)

        def fc(xn):
            # bf16 MXU matmul, f32 accumulation; bias added in f32.
            y = jnp.dot(xn, w_ref[...], preferred_element_type=jnp.float32)
            y = y + b_ref[...].astype(jnp.float32)
            o_ref[...] = y.astype(o_ref.dtype)

        @pl.when(j == 0)
        def _():
            x = x_ref[...].astype(jnp.float32)
            # Single-pass statistics (padded columns are exactly 0, so sums are
            # over the true features; inv_d is 1/true_D_in).
            s = jnp.sum(x, axis=-1, keepdims=True)
            ss = jnp.sum(x * x, axis=-1, keepdims=True)
            mean = s * jnp.float32(inv_d)
            var = jnp.maximum(ss * jnp.float32(inv_d) - mean * mean, 0.0)
            xn = (x - mean) * jax.lax.rsqrt(var + jnp.float32(LN_EPS))
            # gamma is zero in padded columns -> padded xn entries are exactly 0.
            xn = xn * gamma_ref[...].astype(jnp.float32) + beta_ref[...].astype(
                jnp.float32
            )
            xn = xn.astype(xn_ref.dtype)
            xn_ref[...] = xn  # cache for the remaining N-tiles of this row tile
            fc(xn)            # first matmul straight from registers (no reload)

        @pl.when(j > 0)
        def _():
            fc(xn_ref[...])

    return kernel


def _hw_config():
    """Query the TPU generation and derive tile targets / VMEM budget."""
    try:
        vmem_cap = int(pltpu.get_tpu_info().vmem_capacity_bytes)
    except Exception:
        vmem_cap = 128 * 1024 * 1024
    try:
        kind = jax.devices()[0].device_kind.lower()
    except Exception:
        kind = ""

    small_vmem = vmem_cap <= 80 * 1024 * 1024  # v7x-class: 64 MiB per TensorCore
    if small_vmem:
        # v7x: ~996 TF/s bf16 vs 3.2 TB/s HBM -> row-tile balance ~320-512.
        tm_target = 512
    elif "v5" in kind:
        # v5e: 197 TF/s vs ~0.82 TB/s -> balance ~240 rows; bigger buys nothing.
        tm_target = 256
    else:
        # v6e-class (128 MiB VMEM, ~1.4 TB/s): balance ~640-1024 rows.
        tm_target = 1024
    tn_target = 256
    two_cores = small_vmem                      # v7x has 2 TensorCores per chip
    big_vmem = vmem_cap >= 96 * 1024 * 1024     # v5e / v6e class
    return vmem_cap, tm_target, tn_target, two_cores, big_vmem


def mlp_forward(x, gamma, beta, w, b, *, tile_m=None, tile_n=None):
    """x: [B, S, D_in] -> [B, S, D_out].

    gamma/beta: [D_in], w: [D_in, D_out] (transposed vs torch), b: [D_out].
    """
    B, S, D_in = x.shape
    D_out = w.shape[1]
    M = B * S
    out_dtype = x.dtype
    out_bytes = jnp.dtype(out_dtype).itemsize

    # ---- K-dim (feature) padding to an MXU-friendly granule --------------
    kgran = 256 if D_in >= 256 else 128
    D_in_pad = _round_up(D_in, kgran)

    # ---- generation-aware tile selection ----------------------------------
    vmem_cap, tm_target, tn_target, two_cores, big_vmem = _hw_config()
    if tile_m is not None:
        tm_target = tile_m
    if tile_n is not None:
        tn_target = tile_n

    # bf16 x / xn blocks -> keep tm a multiple of 16; output tiles lane-dense.
    tm = _round_up(min(tm_target, _round_up(M, 16)), 16)
    tn = _round_up(min(tn_target, _round_up(D_out, 128)), 128)

    # Megacore guard: on 2-TensorCore chips keep >= 2 row tiles when possible
    # (the j axis must stay "arbitrary" because of the xn scratch dependency).
    if two_cores and M >= 32:
        tm = min(tm, _round_up(-(-M // 2), 16))

    # ---- VMEM budgeting: shrink tiles instead of just clamping the limit ---
    def _vmem_needed(tm_, tn_, w_bufs):
        return (
            2 * tm_ * D_in_pad * 2          # double-buffered bf16 x tiles
            + tm_ * D_in_pad * 2            # bf16 xn scratch
            + w_bufs * D_in_pad * tn_ * 2   # bf16 weight N-slabs
            + 2 * tm_ * tn_ * out_bytes     # double-buffered output tiles
            + 2 * 2 * tn_ * 4               # fc bias tiles (f32)
            + 2 * 2 * D_in_pad * 4          # gamma/beta tiles (f32)
        )

    budget = int(vmem_cap * 0.70)           # leave headroom for Mosaic scratch
    w_bufs = 2
    while _vmem_needed(tm, tn, w_bufs) > budget:
        if tm > 16:
            tm = max(16, _round_up(tm // 2, 16))
        elif tn > 128:
            tn = max(128, _round_up(tn // 2, 128))
        else:
            break

    M_pad = _round_up(M, tm)
    N_pad = _round_up(D_out, tn)
    grid = (M_pad // tm, N_pad // tn)

    # Optional triple-buffered weight slab on large-VMEM chips (v5e/v6e) to
    # hide W-slab DMA jitter when there is more than one N-tile.
    w_index_map = lambda i, j: (0, j)
    if big_vmem and grid[1] > 1 and _vmem_needed(tm, tn, 3) <= budget:
        try:
            w_spec = pl.BlockSpec(
                (D_in_pad, tn), w_index_map, pipeline_mode=pl.Buffered(3)
            )
            w_bufs = 3
        except TypeError:  # older BlockSpec without pipeline_mode
            w_spec = pl.BlockSpec((D_in_pad, tn), w_index_map)
    else:
        w_spec = pl.BlockSpec((D_in_pad, tn), w_index_map)

    vmem_limit = int(
        min(vmem_cap, max(2 * _vmem_needed(tm, tn, w_bufs), 32 * 1024 * 1024))
    )

    # ---- operand prep (bf16 MXU path, zero padding) ------------------------
    x2 = x.reshape(M, D_in).astype(jnp.bfloat16)
    x2 = jnp.pad(x2, ((0, M_pad - M), (0, D_in_pad - D_in)))
    gamma2 = jnp.pad(gamma.astype(jnp.float32), (0, D_in_pad - D_in)).reshape(
        1, D_in_pad
    )
    beta2 = jnp.pad(beta.astype(jnp.float32), (0, D_in_pad - D_in)).reshape(
        1, D_in_pad
    )
    w_p = jnp.pad(w, ((0, D_in_pad - D_in), (0, N_pad - D_out))).astype(jnp.bfloat16)
    b2 = jnp.pad(b.astype(jnp.float32), (0, N_pad - D_out)).reshape(1, N_pad)

    # ---- cost estimate for XLA scheduling ----------------------------------
    cost = pl.CostEstimate(
        flops=int(2 * M * D_in * D_out),
        transcendentals=0,
        bytes_accessed=int(
            M_pad * D_in_pad * 2                     # x (bf16), read once
            + grid[0] * D_in_pad * N_pad * 2         # W re-streamed per row tile
            + M_pad * N_pad * out_bytes              # output
            + N_pad * 4 + 2 * D_in_pad * 4           # bias + gamma/beta
        ),
    )

    out2 = pl.pallas_call(
        _make_mlp_kernel(D_in),
        out_shape=jax.ShapeDtypeStruct((M_pad, N_pad), out_dtype),
        grid_spec=pltpu.PrefetchScalarGridSpec(
            num_scalar_prefetch=0,
            grid=grid,
            in_specs=[
                pl.BlockSpec((tm, D_in_pad), lambda i, j: (i, 0)),   # x rows
                pl.BlockSpec((1, D_in_pad), lambda i, j: (0, 0)),    # ln weight
                pl.BlockSpec((1, D_in_pad), lambda i, j: (0, 0)),    # ln bias
                w_spec,                                              # fc weight slab
                pl.BlockSpec((1, tn), lambda i, j: (0, j)),          # fc bias slab
            ],
            out_specs=pl.BlockSpec((tm, tn), lambda i, j: (i, j)),
            scratch_shapes=[pltpu.VMEM((tm, D_in_pad), jnp.bfloat16)],
        ),
        compiler_params=pltpu.CompilerParams(
            dimension_semantics=("parallel", "arbitrary"),
            vmem_limit_bytes=vmem_limit,
        ),
        cost_estimate=cost,
    )(x2, gamma2, beta2, w_p, b2)

    return out2[:M, :D_out].reshape(B, S, D_out)


def xavier_uniform(key, fan_in, fan_out, dtype=jnp.float32):
    # Matches torch.nn.init.xavier_uniform_ (gain=1): U(-a, a), a = sqrt(6/(fi+fo))
    a = math.sqrt(6.0 / (fan_in + fan_out))
    return jax.random.uniform(key, (fan_in, fan_out), dtype=dtype, minval=-a, maxval=a)


if __name__ == "__main__":
    B, S = 2, 8
    in_features, out_features = 32, 32

    key = jax.random.PRNGKey(0)
    kx, kw = jax.random.split(key)

    x = jax.random.normal(kx, (B, S, in_features), dtype=jnp.float32)

    # Parameters initialized exactly as ModelBase._init_weights would:
    #   LayerNorm: weight=1, bias=0 ; Linear: xavier_uniform weight, zero bias.
    gamma = jnp.ones((in_features,), jnp.float32)
    beta = jnp.zeros((in_features,), jnp.float32)
    # stored as [D_in, D_out] (transpose of torch's [out, in]); xavier is symmetric.
    w = xavier_uniform(kw, in_features, out_features)
    b = jnp.zeros((out_features,), jnp.float32)

    y = mlp_forward(x, gamma, beta, w, b)
    y = jax.block_until_ready(y)

    # Pure-JAX f32 reference (torch semantics).  The kernel runs a bf16 MXU
    # path (bf16 x / W / xn, f32 accumulation), so the tolerance is loosened.
    mean = jnp.mean(x, axis=-1, keepdims=True)
    var = jnp.mean((x - mean) ** 2, axis=-1, keepdims=True)
    xn = (x - mean) / jnp.sqrt(var + LN_EPS) * gamma + beta
    y_ref = xn @ w + b
    assert jnp.allclose(y, y_ref, atol=5e-2, rtol=5e-2), "mismatch vs reference"

    print("KERNEL_OK")
</pallas_src>

<mosaic_0001>
module attributes {stable_mosaic.version = 11 : i64} {
  func.func @kernel(%arg0: i32, %arg1: i32, %arg2: memref<16x128xbf16, #tpu.memory_space<vmem>>, %arg3: memref<1x128xf32, #tpu.memory_space<vmem>>, %arg4: memref<1x128xf32, #tpu.memory_space<vmem>>, %arg5: memref<128x128xbf16, #tpu.memory_space<vmem>>, %arg6: memref<1x128xf32, #tpu.memory_space<vmem>>, %arg7: memref<16x128xf32, #tpu.memory_space<vmem>>, %arg8: memref<16x128xbf16, #tpu.memory_space<vmem>>) attributes {dimension_semantics = [#tpu.dimension_semantics<parallel>, #tpu.dimension_semantics<arbitrary>], iteration_bounds = array<i64: 1, 1>, scalar_prefetch = 0 : i64, scratch_operands = 1 : i64, tpu.core_type = #tpu.core_type<tc>, window_params = [{transform_indices = @transform_0, window_bounds = array<i64: 16, 128>}, {pipeline_mode = #tpu.pipeline_mode<synchronous>, transform_indices = @transform_1, window_bounds = array<i64: 1, 128>}, {pipeline_mode = #tpu.pipeline_mode<synchronous>, transform_indices = @transform_2, window_bounds = array<i64: 1, 128>}, {transform_indices = @transform_3, window_bounds = array<i64: 128, 128>}, {transform_indices = @transform_4, window_bounds = array<i64: 1, 128>}, {transform_indices = @transform_5, window_bounds = array<i64: 16, 128>}]} {
    %c0_i32 = arith.constant 0 : i32
    %0 = arith.cmpi eq, %arg1, %c0_i32 : i32
    %1 = arith.extui %0 : i1 to i32
    %c0_i32_0 = arith.constant 0 : i32
    %2 = arith.cmpi ne, %1, %c0_i32_0 : i32
    scf.if %2 {
      %c0 = arith.constant 0 : index
      %c0_3 = arith.constant 0 : index
      %6 = vector.load %arg2[%c0, %c0_3] : memref<16x128xbf16, #tpu.memory_space<vmem>>, vector<16x128xbf16>
      %7 = arith.extf %6 : vector<16x128xbf16> to vector<16x128xf32>
      %cst = arith.constant dense<0.000000e+00> : vector<16xf32>
      %8 = vector.multi_reduction <add>, %7, %cst [1] : vector<16x128xf32> to vector<16xf32>
      %9 = vector.shape_cast %8 : vector<16xf32> to vector<16x1xf32>
      %10 = arith.mulf %7, %7 : vector<16x128xf32>
      %cst_4 = arith.constant dense<0.000000e+00> : vector<16xf32>
      %11 = vector.multi_reduction <add>, %10, %cst_4 [1] : vector<16x128xf32> to vector<16xf32>
      %12 = vector.shape_cast %11 : vector<16xf32> to vector<16x1xf32>
      %cst_5 = arith.constant 3.125000e-02 : f32
      %13 = vector.broadcast %cst_5 : f32 to vector<16x1xf32>
      %14 = arith.mulf %9, %13 : vector<16x1xf32>
      %cst_6 = arith.constant 3.125000e-02 : f32
      %15 = vector.broadcast %cst_6 : f32 to vector<16x1xf32>
      %16 = arith.mulf %12, %15 : vector<16x1xf32>
      %17 = arith.mulf %14, %14 : vector<16x1xf32>
      %18 = arith.subf %16, %17 : vector<16x1xf32>
      %cst_7 = arith.constant 0.000000e+00 : f32
      %19 = vector.broadcast %cst_7 : f32 to vector<16x1xf32>
      %20 = arith.maximumf %18, %19 : vector<16x1xf32>
      %21 = vector.broadcast %14 : vector<16x1xf32> to vector<16x128xf32>
      %22 = arith.subf %7, %21 : vector<16x128xf32>
      %cst_8 = arith.constant 9.99999974E-6 : f32
      %23 = vector.broadcast %cst_8 : f32 to vector<16x1xf32>
      %24 = arith.addf %20, %23 : vector<16x1xf32>
      %25 = math.rsqrt %24 : vector<16x1xf32>
      %26 = vector.broadcast %25 : vector<16x1xf32> to vector<16x128xf32>
      %27 = arith.mulf %22, %26 : vector<16x128xf32>
      %c0_9 = arith.constant 0 : index
      %c0_10 = arith.constant 0 : index
      %28 = vector.load %arg3[%c0_9, %c0_10] : memref<1x128xf32, #tpu.memory_space<vmem>>, vector<1x128xf32>
      %29 = vector.broadcast %28 : vector<1x128xf32> to vector<16x128xf32>
      %30 = arith.mulf %27, %29 : vector<16x128xf32>
      %c0_11 = arith.constant 0 : index
      %c0_12 = arith.constant 0 : index
      %31 = vector.load %arg4[%c0_11, %c0_12] : memref<1x128xf32, #tpu.memory_space<vmem>>, vector<1x128xf32>
      %32 = vector.broadcast %31 : vector<1x128xf32> to vector<16x128xf32>
      %33 = arith.addf %30, %32 : vector<16x128xf32>
      %34 = arith.truncf %33 : vector<16x128xf32> to vector<16x128xbf16>
      %c0_13 = arith.constant 0 : index
      %c0_14 = arith.constant 0 : index
      %35 = vector.load %arg8[%c0_13, %c0_14] : memref<16x128xbf16, #tpu.memory_space<vmem>>, vector<16x128xbf16>
      tpu.vector_store %arg8[%c0_13, %c0_14], %34 {strides = array<i32>} : memref<16x128xbf16, #tpu.memory_space<vmem>>, vector<16x128xbf16>,
      %c0_15 = arith.constant 0 : index
      %c0_16 = arith.constant 0 : index
      %36 = vector.load %arg5[%c0_15, %c0_16] : memref<128x128xbf16, #tpu.memory_space<vmem>>, vector<128x128xbf16>
      %cst_17 = arith.constant dense<0.000000e+00> : vector<16x128xf32>
      %37 = tpu.matmul %34, %36, %cst_17 {dimension_numbers = #tpu.dot_dimension_numbers<[1], [0], [0], [1], [0, 0, 1, 1], [], []>} : vector<16x128xbf16>, vector<128x128xbf16>, vector<16x128xf32> -> vector<16x128xf32>
      %c0_18 = arith.constant 0 : index
      %c0_19 = arith.constant 0 : index
      %38 = vector.load %arg6[%c0_18, %c0_19] : memref<1x128xf32, #tpu.memory_space<vmem>>, vector<1x128xf32>
      %39 = vector.broadcast %38 : vector<1x128xf32> to vector<16x128xf32>
      %40 = arith.addf %37, %39 : vector<16x128xf32>
      %c0_20 = arith.constant 0 : index
      %c0_21 = arith.constant 0 : index
      %41 = vector.load %arg7[%c0_20, %c0_21] : memref<16x128xf32, #tpu.memory_space<vmem>>, vector<16x128xf32>
      tpu.vector_store %arg7[%c0_20, %c0_21], %40 {strides = array<i32>} : memref<16x128xf32, #tpu.memory_space<vmem>>, vector<16x128xf32>,
    } else {
    }
    %c0_i32_1 = arith.constant 0 : i32
    %3 = arith.cmpi sgt, %arg1, %c0_i32_1 : i32
    %4 = arith.extui %3 : i1 to i32
    %c0_i32_2 = arith.constant 0 : i32
    %5 = arith.cmpi ne, %4, %c0_i32_2 : i32
    scf.if %5 {
      %c0 = arith.constant 0 : index
      %c0_3 = arith.constant 0 : index
      %6 = vector.load %arg8[%c0, %c0_3] : memref<16x128xbf16, #tpu.memory_space<vmem>>, vector<16x128xbf16>
      %c0_4 = arith.constant 0 : index
      %c0_5 = arith.constant 0 : index
      %7 = vector.load %arg5[%c0_4, %c0_5] : memref<128x128xbf16, #tpu.memory_space<vmem>>, vector<128x128xbf16>
      %cst = arith.constant dense<0.000000e+00> : vector<16x128xf32>
      %8 = tpu.matmul %6, %7, %cst {dimension_numbers = #tpu.dot_dimension_numbers<[1], [0], [0], [1], [0, 0, 1, 1], [], []>} : vector<16x128xbf16>, vector<128x128xbf16>, vector<16x128xf32> -> vector<16x128xf32>
      %c0_6 = arith.constant 0 : index
      %c0_7 = arith.constant 0 : index
      %9 = vector.load %arg6[%c0_6, %c0_7] : memref<1x128xf32, #tpu.memory_space<vmem>>, vector<1x128xf32>
      %10 = vector.broadcast %9 : vector<1x128xf32> to vector<16x128xf32>
      %11 = arith.addf %8, %10 : vector<16x128xf32>
      %c0_8 = arith.constant 0 : index
      %c0_9 = arith.constant 0 : index
      %12 = vector.load %arg7[%c0_8, %c0_9] : memref<16x128xf32, #tpu.memory_space<vmem>>, vector<16x128xf32>
      tpu.vector_store %arg7[%c0_8, %c0_9], %11 {strides = array<i32>} : memref<16x128xf32, #tpu.memory_space<vmem>>, vector<16x128xf32>,
    } else {
    }
    return
  }
  func.func @transform_0(%arg0: i32, %arg1: i32) -> (i32, i32) {
    %c0_i32 = arith.constant 0 : i32
    %c0_i32_0 = arith.constant 0 : i32
    return %arg0, %c0_i32 : i32, i32
  }
  func.func @transform_1(%arg0: i32, %arg1: i32) -> (i32, i32) {
    %c0_i32 = arith.constant 0 : i32
    %c0_i32_0 = arith.constant 0 : i32
    %c0_i32_1 = arith.constant 0 : i32
    return %c0_i32, %c0_i32_0 : i32, i32
  }
  func.func @transform_2(%arg0: i32, %arg1: i32) -> (i32, i32) {
    %c0_i32 = arith.constant 0 : i32
    %c0_i32_0 = arith.constant 0 : i32
    %c0_i32_1 = arith.constant 0 : i32
    return %c0_i32, %c0_i32_0 : i32, i32
  }
  func.func @transform_3(%arg0: i32, %arg1: i32) -> (i32, i32) {
    %c0_i32 = arith.constant 0 : i32
    %c0_i32_0 = arith.constant 0 : i32
    return %c0_i32, %arg1 : i32, i32
  }
  func.func @transform_4(%arg0: i32, %arg1: i32) -> (i32, i32) {
    %c0_i32 = arith.constant 0 : i32
    %c0_i32_0 = arith.constant 0 : i32
    return %c0_i32, %arg1 : i32, i32
  }
  func.func @transform_5(%arg0: i32, %arg1: i32) -> (i32, i32) {
    %c0_i32 = arith.constant 0 : i32
    return %arg0, %arg1 : i32, i32
  }
}

</mosaic_0001>

<bundles_post_ra>
// kernel: tpu_custom_call.1
= control target key start
LH: loop header
LB: loop body
LE: loop exit
PB: predicated region body
PF: predicated region fallthrough
CT: control target
= control target key end

     0   :  { %10 = vsyncpa [#allocation4], 0  ;;  %s615_s0 = inlined_call_operand.hbm [shape: bf16[16,128], index: 0, kind: input, shape index: {}]   ;;  %s616_s1 = inlined_call_operand.hbm [shape: f32[1,128], index: 1, kind: input, shape index: {}]   ;;  %s617_s2 = inlined_call_operand.vmem [shape: f32[1,128], index: 2, kind: input, shape index: {}]   ;;  %s618_s3 = inlined_call_operand.hbm [shape: bf16[128,128], index: 3, kind: input, shape index: {}]   ;;  %s619_s4 = inlined_call_operand.vmem [shape: f32[1,128], index: 4, kind: input, shape index: {}]   ;;  %s620_s5 = inlined_call_operand.hbm [shape: f32[16,128], index: 5, kind: output, shape index: {}]  }
   0x1   :  { %11 = vsyncpa [#allocation7], 0  ;;  %s31_s20 = sshll.u32 %s616_s1, 4  ;;  %s32_s20 = int_to_ptr.hbm [resolvable:$true] %s31_s20 }
   0x2   :  { %12 = vsyncpa [#allocation5], 0  ;;  %s553_s21 = smov [#allocation6]   ;;  %s17_s25 = sshll.u32 %s615_s0, 4  ;;  %s18_s25 = int_to_ptr.hbm [resolvable:$true] %s17_s25 }
   0x3   :  { %s33_s22 = sshll.u32 %s553_s21, 4  ;;  %s554_s26 = smov [#allocation3]   ;;  %s34_s22 = int_to_ptr.vmem [resolvable:$true] %s33_s22 }
   0x4   :  { %36 = dma.hbm_to_vmem [thread:$0]  %s32_s20, 16, %s34_s22, [#allocation7]  }
   0x5   :  { %s19_s27 = sshll.u32 %s554_s26, 4  ;;  %s555_s28 = smov 64   ;;  %s20_s27 = int_to_ptr.vmem [resolvable:$true] %s19_s27 }
   0x6   :  { %s556_s29 = smov 4   ;;  %s43_s1 = sshll.u32 %s618_s3, 4  ;;  %s44_s1 = int_to_ptr.hbm [resolvable:$true] %s43_s1 }
   0x7   :  { %25 = dma.hbm_to_vmem [thread:$0]  %s18_s25, 128, %s20_s27, [#allocation4], %s555_s28, %s555_s28, %s556_s29  }
   0x8   :  { %s557_s7 = smov [#allocation8]  }
   0x9   :  { %s45_s8 = sshll.u32 %s557_s7, 4  ;;  %s46_s8 = int_to_ptr.vmem [resolvable:$true] %s45_s8 }
   0xa   :  { %51 = dma.hbm_to_vmem [thread:$0]  %s44_s1, 1024, %s46_s8, [#allocation7], %s555_s28, %s555_s28, %s556_s29  }
   0xb   :  { %547 = dma.done.wait [#allocation4], 128  }
   0xc   :  { %548 = vsyncadd [#allocation4], 4294967168 }
   0xd   :  { %549 = dma.done.wait [#allocation7], 1040  }
   0xe   :  { %550 = vsyncadd [#allocation7], 4294966256  ;;  %v428_v0 = vld [vmem:[#allocation3] sm:$0xff]   ;;  %v415_v7 = vld [vmem:[#allocation8 + $0x28] sm:$0xff]  ;;  %s328_s14 = sshll.u32 %s620_s5, 4  ;;  %s559_s15 = smov 128   ;;  %s329_s14 = int_to_ptr.hbm [resolvable:$true] %s328_s14 }
   0xf   :  { %v429_v1 = vunpack.c.l.bf16 %v428_v0  ;;  %v600_v3 = vunpack.c.h.bf16 %v428_v0  ;;  %v417_v5 = vld [vmem:[#allocation8 + $0x38] sm:$0xff]  ;;  %v416_v6 = vld [vmem:[#allocation8 + $0x30] sm:$0xff]  ;;  %v414_v8 = vld [vmem:[#allocation8 + $0x20] sm:$0xff]  ;;  %s560_s16 = smov 8  }
  0x10   :  { %210 = vmatpush.bf16.msra.mxu0 %v417_v5  ;;  %v413_v11 = vld [vmem:[#allocation8 + $0x18] sm:$0xff]  ;;  %v412_v15 = vld [vmem:[#allocation8 + $0x10] sm:$0xff]  ;;  %v411_v18 = vld [vmem:[#allocation8 + $0x8] sm:$0xff] }
  0x11   :  { %74 = vadd.xlane.f32.xlu0 %v429_v1  ;;  %v78_v2 = vmul.f32 %v429_v1, %v429_v1  ;;  %v79_v4 = vmul.f32 %v600_v3, %v600_v3  ;;  %v410_v24 = vld [vmem:[#allocation8] sm:$0xff]  ;;  %v444_v41 = vld [vmem:[#allocation6] ss:$0 sm:$0xff]  ;;  %v445_v45 = vld [vmem:[%s617_s2] ss:$0 sm:$0xff]  ;;  %s558_s2 = smov [#allocation9]  }
  0x12   :  { %v446_v58 = vld [vmem:[%s619_s4] ss:$0 sm:$0xff]  ;;  %s326_s11 = sshll.u32 %s558_s2, 4  ;;  %s327_s11 = int_to_ptr.vmem [resolvable:$true] %s326_s11 }
  0x13   :  { %80 = vadd.xlane.f32.xlu1 %v78_v2 }
  0x14   :  { %211 = vmatpush.bf16.msra.mxu0 %v416_v6 }
  0x18   :  { %212 = vmatpush.bf16.msra.mxu0 %v415_v7 }
  0x19   :  { %76 = vadd.xlane.f32.xlu0 %v600_v3 }
  0x1b   :  { %82 = vadd.xlane.f32.xlu1 %v79_v4 }
  0x1c   :  { %213 = vmatpush.bf16.msra.mxu0 %v414_v8 }
  0x20   :  { %214 = vmatpush.bf16.msra.mxu0 %v413_v11 }
  0x24   :  { %215 = vmatpush.bf16.msra.mxu0 %v412_v15 }
  0x28   :  { %216 = vmatpush.bf16.msra.mxu0 %v411_v18 }
  0x2c   :  { %217 = vmatpush.bf16.msra.mxu0 %v410_v24 }
  0x84   :  { %v75_v9 = vpop.xlane.xlu0 %74 }
  0x85   :  { %v84_v10 = vmul.f32 0.03125, %v75_v9 }
  0x86   :  { %v81_v12 = vpop.xlane.xlu1 %80 }
  0x87   :  { %v88_v13 = vmul.f32 %v84_v10, %v84_v10  ;;  %v86_v14 = vmul.f32 0.03125, %v81_v12  ;;  %v94_v37 = vsub.f32 %v429_v1, %v84_v10 }
  0x89   :  { %v90_v16 = vsub.f32 %v86_v14, %v88_v13 }
  0x8b   :  { %v92_v17 = vmax.f32 %v90_v16, 0.0 }
  0x8c   :  { %v77_v19 = vpop.xlane.xlu0 %76 }
  0x8d   :  { %v96_v20 = vadd.f32 1e-05, %v92_v17  ;;  %v85_v21 = vmul.f32 0.03125, %v77_v19 }
  0x8e   :  { %v83_v22 = vpop.xlane.xlu1 %82 }
  0x8f   :  { %447 = vrsqrt.f32 %v96_v20  ;;  %v89_v23 = vmul.f32 %v85_v21, %v85_v21  ;;  %v87_v25 = vmul.f32 0.03125, %v83_v22  ;;  %vm104_vm1 = vweird.f32 %v96_v20 }
  0x90   :  { %v95_v47 = vsub.f32 %v600_v3, %v85_v21 }
  0x91   :  { %v91_v26 = vsub.f32 %v87_v25, %v89_v23 }
  0x93   :  { %v93_v27 = vmax.f32 %v91_v26, 0.0 }
  0x95   :  { %v448_v28 = vpop.eup %447  ;;  %v97_v30 = vadd.f32 1e-05, %v93_v27 }
  0x96   :  { %v99_v29 = vmul.f32 %v448_v28, %v96_v20  ;;  %vm105_vm0 = vweird.f32 %v448_v28 }
  0x97   :  { %449 = vrsqrt.f32 %v97_v30  ;;  %vm106_vm2 = vmor %vm104_vm1, %vm105_vm0  ;;  %vm114_vm4 = vweird.f32 %v97_v30 }
  0x98   :  { %v100_v31 = vmul.f32 %v448_v28, %v99_v29 }
  0x9a   :  { %v101_v32 = vmul.f32 0.5, %v100_v31 }
  0x9c   :  { %v102_v33 = vsub.f32 1.5, %v101_v32 }
  0x9d   :  { %v450_v34 = vpop.eup %449 }
  0x9e   :  { %v103_v35 = vmul.f32 %v448_v28, %v102_v33  ;;  %v109_v36 = vmul.f32 %v450_v34, %v97_v30  ;;  %vm115_vm3 = vweird.f32 %v450_v34 }
  0x9f   :  { %vm116_vm5 = vmor %vm114_vm4, %vm115_vm3 }
  0xa0   :  { %v107_v38 = vsel %vm106_vm2, %v448_v28, %v103_v35  ;;  %v110_v39 = vmul.f32 %v450_v34, %v109_v36 }
  0xa1   :  { %v118_v40 = vmul.f32 %v107_v38, %v94_v37 }
  0xa2   :  { %v111_v42 = vmul.f32 0.5, %v110_v39 }
  0xa3   :  { %v124_v44 = vmul.f32 %v444_v41, %v118_v40 }
  0xa4   :  { %v112_v43 = vsub.f32 1.5, %v111_v42 }
  0xa5   :  { %v130_v50 = vadd.f32 %v445_v45, %v124_v44 }
  0xa6   :  { %v113_v46 = vmul.f32 %v450_v34, %v112_v43 }
  0xa7   :  { %v132_v53 = vpack.c.bf16 %v130_v50, %v130_v50 }
  0xa8   :  { %v117_v48 = vsel %vm116_vm5, %v450_v34, %v113_v46 }
  0xa9   :  { %v119_v49 = vmul.f32 %v117_v48, %v95_v47  ;;  %v158_v55 = vunpack.c.l.b16 %v132_v53 }
  0xab   :  { %v125_v51 = vmul.f32 %v444_v41, %v119_v49 }
  0xad   :  { %v131_v52 = vadd.f32 %v445_v45, %v125_v51 }
  0xaf   :  { %v133_v54 = vpack.c.bf16 %v131_v52, %v131_v52 }
  0xb1   :  { %v159_v56 = vunpack.c.l.b16 %v133_v54 }
  0xb3   :  { %v160_v57 = vpack.c.b16 %v159_v56, %v158_v55 }
  0xb5   :  { %218 = vmatmul.bf16.vlgmr.msra.gmra.mxu0 %v160_v57 }
 0x132   :  { %v219_v59 = vpop.f32.mrf.mxu0 }
 0x133   :  { %v220_v60 = vadd.f32 %v446_v58, %v219_v59 }
 0x135   :  { %224 = vst [vmem:[#allocation9] sm:$0xff] %v220_v60 }
 0x13a   :  { %v221_v61 = vpop.f32.mrf.mxu0 }
 0x13b   :  { %v222_v62 = vadd.f32 %v446_v58, %v221_v61 }
 0x13d   :  { %225 = vst [vmem:[#allocation9 + $0x8] sm:$0xff] %v222_v62 }
 0x13e   :  { %334 = dma.vmem_to_hbm [thread:$0]  %s327_s11, 256, %s329_s14, [#allocation5], %s559_s15, %s559_s15, %s560_s16  }
 0x13f   :  { %551 = dma.done.wait [#allocation5], 256  }
 0x140   :  { %552 = vsyncadd [#allocation5], 4294967040 }
 0x141   :  { %339 = vsyncpa [#allocation4], 1 }
 0x142   :  { %340 = vsyncpa [#allocation7], 1 }
 0x143   :  { %341 = vsyncpa [#allocation5], 1 }

</bundles_post_ra>
